<compile_context>
chip_gen: v7x
topology: tpu7x:2x2x1
jax: 0.10.0
libtpu: 0.0.40
codegen_flags: <defaults>
</compile_context>

<pallas_src>
import functools

import numpy as np
import jax
import jax.numpy as jnp
from jax import lax
from jax.experimental import pallas as pl
from jax.experimental.pallas import tpu as pltpu


# ----------------------------------------------------------------------------
# Parameter construction (plain JAX / numpy glue — mirrors ESNCell.__init__)
# ----------------------------------------------------------------------------
def to_sparse(key, tensor, density):
    """Mirror torch_rc to_sparse (dense-mask variant)."""
    if density < 1.0:
        mask = (jax.random.uniform(key, tensor.shape) <= density).astype(tensor.dtype)
        return tensor * mask
    return tensor


def rescale_contractivity(W, coeff, method):
    # TODO(synk): eigen-decomposition (specrad) has no Pallas equivalent; done
    # host-side with numpy exactly like torch's .eig() at module-init time.
    W_np = np.asarray(W, dtype=np.float64)
    if method == "norm":
        return W * (coeff / float(np.linalg.norm(W_np)))
    elif method == "specrad":
        eigvals = np.linalg.eigvals(W_np)
        specrad = float(np.max(np.abs(eigvals)))
        return W * (coeff / specrad)
    else:
        raise ValueError("Invalid rescaling method")


def make_esn_params(
    key,
    input_size,
    output_size,
    bias=True,
    scale_rec=0.9,
    density_rec=1.0,
    scale_in=1.0,
    density_in=1.0,
    scale_bias=1.0,
    rec_rescaling_method="specrad",
):
    k1, k2, k3, k4, k5 = jax.random.split(key, 5)
    # torch.rand() * 2 - 1  ->  uniform[-1, 1)
    W_in = jax.random.uniform(k1, (output_size, input_size), jnp.float32) * 2.0 - 1.0
    W_hat = jax.random.uniform(k2, (output_size, output_size), jnp.float32) * 2.0 - 1.0
    b = (jax.random.uniform(k3, (output_size,), jnp.float32) * 2.0 - 1.0) if bias else None

    W_in = to_sparse(k4, W_in, density_in)
    W_hat = to_sparse(k5, W_hat, density_rec)

    W_in = scale_in * W_in
    W_hat = rescale_contractivity(W_hat, scale_rec, rec_rescaling_method)
    if bias:
        b = scale_bias * b
    return W_in, W_hat, b


# ----------------------------------------------------------------------------
# One-time weight preparation: transpose + pad hidden dim to 128 lanes + cast.
# ----------------------------------------------------------------------------
def _round_up(x, m):
    return (x + m - 1) // m * m


def prepare_esn_weights(W_in, W_hat, b, compute_dtype=jnp.bfloat16):
    """Returns (win_t, what_t, b2d) for the kernel / pre-GEMM.

    win_t : (I,  Hp) compute_dtype  (= W_in^T, hidden dim zero-padded)
    what_t: (Hp, Hp) compute_dtype  (= W_hat^T, zero-padded)
    b2d   : (1,  Hp) float32        (zeros where bias absent / padded)
    Padded hidden lanes are zero, so they provably stay zero through the
    recurrence (tanh(0)=0) and never contaminate real lanes.
    """
    H, I = W_in.shape
    Hp = _round_up(H, 128)
    win_t = jnp.zeros((I, Hp), compute_dtype).at[:, :H].set(
        W_in.T.astype(compute_dtype))
    what_t = jnp.zeros((Hp, Hp), compute_dtype).at[:H, :H].set(
        W_hat.T.astype(compute_dtype))
    b_f32 = jnp.zeros((H,), jnp.float32) if b is None else b.astype(jnp.float32)
    b2d = jnp.zeros((1, Hp), jnp.float32).at[0, :H].set(b_f32)
    return win_t, what_t, b2d


# ----------------------------------------------------------------------------
# Pallas kernel: fused recurrence.  grid = (batch_blocks, time_blocks)
#   * W_hat^T resident (constant index map), hidden state carried in f32 scratch
#   * TT timesteps per grid step via an unrolled fori_loop
# ----------------------------------------------------------------------------
def esn_recurrence_kernel(u_ref, h0_ref, what_ref, out_ref, h_scr,
                          *, leaking_rate, tt):
    # u_ref:    (TT, Bblk, Hp)  precomputed x_t @ W_in^T + b (streamed)
    # h0_ref:   (Bblk, Hp)      initial hidden state (used only at t_blk == 0)
    # what_ref: (Hp, Hp)        W_hat^T (resident, f32 or bf16)
    # out_ref:  (TT, Bblk, Hp)  hidden states for this time block
    # h_scr:    (Bblk, Hp)      f32 carried hidden state
    t_blk = pl.program_id(1)

    @pl.when(t_blk == 0)
    def _init():
        h_scr[...] = h0_ref[...]

    cdt = what_ref.dtype                    # matmul operand dtype (f32 / bf16)
    w = what_ref[...]                       # hoisted: resident weight load

    def step(i, h):
        pre = jnp.dot(h.astype(cdt), w, preferred_element_type=jnp.float32)
        pre = pre + u_ref[i].astype(jnp.float32)
        h_tilde = jnp.tanh(pre)
        h_new = h + leaking_rate * (h_tilde - h)      # f32 blend (1 FMA-ish op)
        out_ref[i] = h_new.astype(out_ref.dtype)
        return h_new

    h_scr[...] = lax.fori_loop(0, tt, step, h_scr[...], unroll=True)


def esn_rollout(xs, h0, win_t, what_t, b2d, leaking_rate, *,
                time_block=8, batch_block=None, u_dtype=None,
                out_dtype=jnp.float32):
    """Fused rollout. xs: (T, B, I), h0: (B, H) -> hidden states (T, B, H)."""
    T, B, I = xs.shape
    H = h0.shape[1]
    Hp = what_t.shape[0]
    assert win_t.shape == (I, Hp), (win_t.shape, (I, Hp))
    cdt = what_t.dtype
    u_dtype = jnp.dtype(cdt) if u_dtype is None else jnp.dtype(u_dtype)
    out_dtype = jnp.dtype(out_dtype)

    itemsize = jnp.dtype(cdt).itemsize
    min_sub = 8 if itemsize >= 4 else (16 if itemsize == 2 else 32)

    Bp = _round_up(B, min_sub)
    if batch_block is None:
        Bblk = Bp
    else:
        Bblk = min(_round_up(int(batch_block), min_sub), Bp)
        Bp = _round_up(Bp, Bblk)

    TT = max(1, min(int(time_block), T))
    Tp = _round_up(T, TT)

    # ---- hoisted input projection: ONE big MXU-friendly GEMM, off the serial
    # path.  Bias folded in here, so the per-step body is matmul+tanh+blend.
    u = jnp.dot(xs.reshape(T * B, I).astype(cdt), win_t,
                preferred_element_type=jnp.float32) + b2d
    u = u.reshape(T, B, Hp)
    u = jnp.pad(u, ((0, Tp - T), (0, Bp - B), (0, 0))).astype(u_dtype)

    h0_p = jnp.pad(h0.astype(jnp.float32), ((0, Bp - B), (0, Hp - H)))

    kernel = functools.partial(esn_recurrence_kernel,
                               leaking_rate=float(leaking_rate), tt=TT)

    w_bytes = Hp * Hp * itemsize
    cost = pl.CostEstimate(
        flops=2 * Tp * Bp * Hp * Hp,
        transcendentals=Tp * Bp * Hp,
        bytes_accessed=int(w_bytes
                           + u.size * u.dtype.itemsize
                           + Tp * Bp * Hp * out_dtype.itemsize
                           + Bp * Hp * 4),
    )

    # Conservative VMEM budget: assume every input is double-buffered, even
    # the constant-index-map ones.
    # TODO(synk): verify via pl.lower_as_mlir that the resident W_hat^T block
    # is single-buffered; if not, stage it via pl.ANY + sync_copy (halves the
    # resident footprint — matters most on v7x's 64 MiB VMEM).
    blk_u = TT * Bblk * Hp * u.dtype.itemsize
    blk_o = TT * Bblk * Hp * out_dtype.itemsize
    vmem_needed = (2 * (blk_u + blk_o)
                   + 2 * (w_bytes + Bblk * Hp * 4)
                   + Bblk * Hp * 4)

    cp_kwargs = dict(dimension_semantics=("parallel", "arbitrary"))
    if vmem_needed > 16 * 1024 * 1024:
        try:
            vmem_cap = int(pltpu.get_tpu_info().vmem_capacity_bytes)
        except Exception:
            vmem_cap = 64 * 1024 * 1024        # v7x-safe fallback
        cp_kwargs["vmem_limit_bytes"] = int(
            min(vmem_needed + (vmem_needed >> 2), vmem_cap - (8 << 20)))
        # TODO(synk): for H so large that W_hat^T alone exceeds the cap, tile
        # the recurrent contraction over K-tiles of Hp with an f32 accumulator
        # instead of keeping the whole matrix resident.

    grid_spec = pltpu.PrefetchScalarGridSpec(
        num_scalar_prefetch=0,
        grid=(Bp // Bblk, Tp // TT),
        in_specs=[
            pl.BlockSpec((TT, Bblk, Hp), lambda b, t: (t, b, 0)),  # U_t stream
            pl.BlockSpec((Bblk, Hp), lambda b, t: (b, 0)),         # h0
            pl.BlockSpec((Hp, Hp), lambda b, t: (0, 0)),           # W_hat^T
        ],
        out_specs=pl.BlockSpec((TT, Bblk, Hp), lambda b, t: (t, b, 0)),
        scratch_shapes=[pltpu.VMEM((Bblk, Hp), jnp.float32)],      # f32 carry
    )

    out_p = pl.pallas_call(
        kernel,
        out_shape=jax.ShapeDtypeStruct((Tp, Bp, Hp), out_dtype),
        grid_spec=grid_spec,
        compiler_params=pltpu.CompilerParams(**cp_kwargs),
        cost_estimate=cost,
    )(u, h0_p, what_t)

    return out_p[:T, :B, :H]


def esn_cell_forward(x, hidden, win_t, what_t, b2d, leaking_rate):
    """Single ESNCell.forward step (module semantics). x: (B, I), hidden: (B, H)."""
    return esn_rollout(x[None], hidden, win_t, what_t, b2d, leaking_rate)[0]


# ----------------------------------------------------------------------------
# Pure-JAX references
# ----------------------------------------------------------------------------
def esn_cell_ref(x, h, W_in, W_hat, b, leaking_rate, compute_dtype=jnp.float32):
    wi = W_in.astype(compute_dtype)
    wh = W_hat.astype(compute_dtype)
    pre = jnp.dot(x.astype(compute_dtype), wi.T,
                  preferred_element_type=jnp.float32)
    pre = pre + jnp.dot(h.astype(compute_dtype), wh.T,
                        preferred_element_type=jnp.float32)
    if b is not None:
        pre = pre + b[None, :].astype(jnp.float32)
    h_tilde = jnp.tanh(pre)
    return (1.0 - leaking_rate) * h.astype(jnp.float32) + leaking_rate * h_tilde


def esn_rollout_ref(xs, h0, W_in, W_hat, b, leaking_rate,
                    compute_dtype=jnp.float32):
    hs = []
    h = h0.astype(jnp.float32)
    for t in range(xs.shape[0]):
        h = esn_cell_ref(xs[t], h, W_in, W_hat, b, leaking_rate, compute_dtype)
        hs.append(h)
    return jnp.stack(hs)


if __name__ == "__main__":
    key = jax.random.PRNGKey(0)
    kp, kx, kh, ks = jax.random.split(key, 4)

    batch = 8
    input_size = 16
    hidden_size = 32
    seq_len = 8
    leaking_rate = 0.5

    W_in, W_hat, b = make_esn_params(
        kp, input_size, hidden_size, bias=True,
        scale_rec=0.9, density_rec=1.0, scale_in=1.0, density_in=1.0,
        scale_bias=1.0, rec_rescaling_method="specrad",
    )

    x = jax.random.normal(kx, (batch, input_size), jnp.float32)
    h0 = jax.random.normal(kh, (batch, hidden_size), jnp.float32)
    xs = jax.random.normal(ks, (seq_len, batch, input_size), jnp.float32)

    # --- f32 weights: single step (exact module forward semantics) ----------
    win32, what32, b32 = prepare_esn_weights(W_in, W_hat, b, jnp.float32)
    out = jax.block_until_ready(
        esn_cell_forward(x, h0, win32, what32, b32, leaking_rate))
    ref = esn_cell_ref(x, h0, W_in, W_hat, b, leaking_rate)
    np.testing.assert_allclose(np.asarray(out), np.asarray(ref),
                               rtol=2e-5, atol=2e-5)

    # --- f32 weights: fused T-step rollout (hoisted U, blocked time axis) ---
    outs = jax.block_until_ready(
        esn_rollout(xs, h0, win32, what32, b32, leaking_rate, time_block=8))
    refs = esn_rollout_ref(xs, h0, W_in, W_hat, b, leaking_rate)
    np.testing.assert_allclose(np.asarray(outs), np.asarray(refs),
                               rtol=1e-4, atol=1e-4)

    # --- bf16 (default) path: bf16 weights / operands / streamed U, f32
    #     accumulation, f32 carry / tanh / blend ------------------------------
    win16, what16, b16 = prepare_esn_weights(W_in, W_hat, b)   # bf16 default
    outs16 = jax.block_until_ready(
        esn_rollout(xs, h0, win16, what16, b16, leaking_rate, time_block=8))
    refs16 = esn_rollout_ref(xs, h0, W_in, W_hat, b, leaking_rate,
                             compute_dtype=jnp.bfloat16)
    np.testing.assert_allclose(np.asarray(outs16), np.asarray(refs16),
                               rtol=2e-2, atol=2e-2)

    print("KERNEL_OK")
</pallas_src>

<mosaic_0001>
module attributes {stable_mosaic.version = 11 : i64} {
  func.func @esn_recurrence_kernel(%arg0: i32, %arg1: i32, %arg2: memref<1x8x128xf32, #tpu.memory_space<vmem>>, %arg3: memref<8x128xf32, #tpu.memory_space<vmem>>, %arg4: memref<128x128xf32, #tpu.memory_space<vmem>>, %arg5: memref<1x8x128xf32, #tpu.memory_space<vmem>>, %arg6: memref<8x128xf32, #tpu.memory_space<vmem>>) attributes {dimension_semantics = [#tpu.dimension_semantics<parallel>, #tpu.dimension_semantics<arbitrary>], iteration_bounds = array<i64: 1, 1>, scalar_prefetch = 0 : i64, scratch_operands = 1 : i64, tpu.core_type = #tpu.core_type<tc>, window_params = [{transform_indices = @transform_0, window_bounds = array<i64: 1, 8, 128>}, {transform_indices = @transform_1, window_bounds = array<i64: 8, 128>}, {pipeline_mode = #tpu.pipeline_mode<synchronous>, transform_indices = @transform_2, window_bounds = array<i64: 128, 128>}, {transform_indices = @transform_3, window_bounds = array<i64: 1, 8, 128>}]} {
    %c0_i32 = arith.constant 0 : i32
    %0 = arith.cmpi eq, %arg1, %c0_i32 : i32
    %1 = arith.extui %0 : i1 to i32
    %c0_i32_0 = arith.constant 0 : i32
    %2 = arith.cmpi ne, %1, %c0_i32_0 : i32
    scf.if %2 {
      %c0_12 = arith.constant 0 : index
      %c0_13 = arith.constant 0 : index
      %20 = vector.load %arg3[%c0_12, %c0_13] : memref<8x128xf32, #tpu.memory_space<vmem>>, vector<8x128xf32>
      %c0_14 = arith.constant 0 : index
      %c0_15 = arith.constant 0 : index
      %21 = vector.load %arg6[%c0_14, %c0_15] : memref<8x128xf32, #tpu.memory_space<vmem>>, vector<8x128xf32>
      tpu.vector_store %arg6[%c0_14, %c0_15], %20 {strides = array<i32>} : memref<8x128xf32, #tpu.memory_space<vmem>>, vector<8x128xf32>,
    } else {
    }
    %c0 = arith.constant 0 : index
    %c0_1 = arith.constant 0 : index
    %3 = vector.load %arg4[%c0, %c0_1] : memref<128x128xf32, #tpu.memory_space<vmem>>, vector<128x128xf32>
    %c0_2 = arith.constant 0 : index
    %c0_3 = arith.constant 0 : index
    %4 = vector.load %arg6[%c0_2, %c0_3] : memref<8x128xf32, #tpu.memory_space<vmem>>, vector<8x128xf32>
    %c0_i32_4 = arith.constant 0 : i32
    %cst = arith.constant dense<0.000000e+00> : vector<8x128xf32>
    %5 = tpu.matmul %4, %3, %cst {dimension_numbers = #tpu.dot_dimension_numbers<[1], [0], [0], [1], [0, 0, 1, 1], [], []>} : vector<8x128xf32>, vector<128x128xf32>, vector<8x128xf32> -> vector<8x128xf32>
    %6 = arith.index_cast %c0_i32_4 : i32 to index
    %c0_5 = arith.constant 0 : index
    %c0_6 = arith.constant 0 : index
    %7 = vector.load %arg2[%6, %c0_5, %c0_6] : memref<1x8x128xf32, #tpu.memory_space<vmem>>, vector<1x8x128xf32>
    %8 = vector.shape_cast %7 : vector<1x8x128xf32> to vector<8x128xf32>
    %9 = arith.addf %5, %8 : vector<8x128xf32>
    %10 = math.tanh %9 : vector<8x128xf32>
    %11 = arith.subf %10, %4 : vector<8x128xf32>
    %cst_7 = arith.constant 5.000000e-01 : f32
    %12 = vector.broadcast %cst_7 : f32 to vector<8x128xf32>
    %13 = arith.mulf %12, %11 : vector<8x128xf32>
    %14 = arith.addf %4, %13 : vector<8x128xf32>
    %15 = arith.index_cast %c0_i32_4 : i32 to index
    %c0_8 = arith.constant 0 : index
    %c0_9 = arith.constant 0 : index
    %16 = vector.load %arg5[%15, %c0_8, %c0_9] : memref<1x8x128xf32, #tpu.memory_space<vmem>>, vector<1x8x128xf32>
    %17 = vector.shape_cast %16 : vector<1x8x128xf32> to vector<8x128xf32>
    %18 = vector.shape_cast %14 : vector<8x128xf32> to vector<1x8x128xf32>
    tpu.vector_store %arg5[%15, %c0_8, %c0_9], %18 {strides = array<i32>} : memref<1x8x128xf32, #tpu.memory_space<vmem>>, vector<1x8x128xf32>,
    %c1_i32 = arith.constant 1 : i32
    %c0_10 = arith.constant 0 : index
    %c0_11 = arith.constant 0 : index
    %19 = vector.load %arg6[%c0_10, %c0_11] : memref<8x128xf32, #tpu.memory_space<vmem>>, vector<8x128xf32>
    tpu.vector_store %arg6[%c0_10, %c0_11], %14 {strides = array<i32>} : memref<8x128xf32, #tpu.memory_space<vmem>>, vector<8x128xf32>,
    return
  }
  func.func @transform_0(%arg0: i32, %arg1: i32) -> (i32, i32, i32) {
    %c0_i32 = arith.constant 0 : i32
    %c0_i32_0 = arith.constant 0 : i32
    return %arg1, %arg0, %c0_i32 : i32, i32, i32
  }
  func.func @transform_1(%arg0: i32, %arg1: i32) -> (i32, i32) {
    %c0_i32 = arith.constant 0 : i32
    %c0_i32_0 = arith.constant 0 : i32
    return %arg0, %c0_i32 : i32, i32
  }
  func.func @transform_2(%arg0: i32, %arg1: i32) -> (i32, i32) {
    %c0_i32 = arith.constant 0 : i32
    %c0_i32_0 = arith.constant 0 : i32
    %c0_i32_1 = arith.constant 0 : i32
    return %c0_i32, %c0_i32_0 : i32, i32
  }
  func.func @transform_3(%arg0: i32, %arg1: i32) -> (i32, i32, i32) {
    %c0_i32 = arith.constant 0 : i32
    %c0_i32_0 = arith.constant 0 : i32
    return %arg1, %arg0, %c0_i32 : i32, i32, i32
  }
}

</mosaic_0001>

<bundles_post_ra>
// kernel: tpu_custom_call.1
= control target key start
LH: loop header
LB: loop body
LE: loop exit
PB: predicated region body
PF: predicated region fallthrough
CT: control target
= control target key end

     0   :  { %8 = vsyncpa [#allocation4], 0  ;;  %s426_s0 = inlined_call_operand.hbm [shape: f32[1,8,128], index: 0, kind: input, shape index: {}]   ;;  %s427_s1 = inlined_call_operand.hbm [shape: f32[8,128], index: 1, kind: input, shape index: {}]   ;;  %s428_s2 = inlined_call_operand.hbm [shape: f32[128,128], index: 2, kind: input, shape index: {}]   ;;  %s429_s3 = inlined_call_operand.hbm [shape: f32[1,8,128], index: 3, kind: output, shape index: {}]  }
   0x1   :  { %9 = vsyncpa [#allocation7], 0 }
   0x2   :  { %10 = vsyncpa [#allocation5], 0  ;;  %s349_s12 = smov [#allocation6]   ;;  %s350_s14 = smov [#allocation3]  }
   0x3   :  { %s27_s13 = sshll.u32 %s349_s12, 4  ;;  %s17_s15 = sshll.u32 %s350_s14, 4  ;;  %s28_s13 = int_to_ptr.vmem [resolvable:$true] %s27_s13  ;;  %s18_s15 = int_to_ptr.vmem [resolvable:$true] %s17_s15 }
   0x4   :  { %s255_s18 = scalar_lea.hbm %s427_s1, 128 }
   0x5   :  { %p256_p0 = scmp.ne.s32.totalorder %s427_s1, %s255_s18  ;;  %p259_p1 = scmp.lt.u32.totalorder %s255_s18, %s427_s1 }
   0x7   :  { %p261_p2 = pnand %p259_p1, %p256_p0 }
   0x9   :  { %264 = shalt.err (!%p261_p2)
}
   0xa   :  { %s265_s23 = scalar_lea.vmem %s28_s13, 128  ;;  %p270_p4 = scmp.lt.s32.totalorder %s28_s13, %s28_s13 }
   0xb   :  { %p266_p3 = scmp.ne.s32.totalorder %s28_s13, %s265_s23  ;;  %p271_p5 = scmp.lt.s32.totalorder %s265_s23, %s265_s23 }
   0xd   :  { %p272_p6 = por %p271_p5, %p270_p4 }
   0xf   :  { %p273_p7 = pnand %p272_p6, %p266_p3 }
  0x11   :  { %276 = shalt.err (!%p273_p7)
}
  0x12   :  { %30 = dma.hbm_to_vmem [thread:$0]  %s427_s1, 128, %s28_s13, [#allocation7]  }
  0x13   :  { %s277_s28 = scalar_lea.hbm %s426_s0, 128 }
  0x14   :  { %p278_p8 = scmp.ne.s32.totalorder %s426_s0, %s277_s28  ;;  %p281_p9 = scmp.lt.u32.totalorder %s277_s28, %s426_s0 }
  0x16   :  { %p283_p10 = pnand %p281_p9, %p278_p8 }
  0x18   :  { %286 = shalt.err (!%p283_p10)
}
  0x19   :  { %s287_s6 = scalar_lea.vmem %s18_s15, 128  ;;  %p292_p12 = scmp.lt.s32.totalorder %s18_s15, %s18_s15 }
  0x1a   :  { %p288_p11 = scmp.ne.s32.totalorder %s18_s15, %s287_s6  ;;  %p293_p13 = scmp.lt.s32.totalorder %s287_s6, %s287_s6 }
  0x1c   :  { %p294_p0 = por %p293_p13, %p292_p12 }
  0x1e   :  { %p295_p1 = pnand %p294_p0, %p288_p11 }
  0x20   :  { %298 = shalt.err (!%p295_p1)
}
  0x21   :  { %20 = dma.hbm_to_vmem [thread:$0]  %s426_s0, 128, %s18_s15, [#allocation4]  }
  0x22   :  { %s351_s8 = smov [#allocation8]   ;;  %s299_s12 = scalar_lea.hbm %s428_s2, 2048 }
  0x23   :  { %s36_s9 = sshll.u32 %s351_s8, 4  ;;  %p300_p2 = scmp.ne.s32.totalorder %s428_s2, %s299_s12  ;;  %s37_s9 = int_to_ptr.vmem [resolvable:$true] %s36_s9 }
  0x24   :  { %p303_p3 = scmp.lt.u32.totalorder %s299_s12, %s428_s2 }
  0x26   :  { %p305_p4 = pnand %p303_p3, %p300_p2 }
  0x28   :  { %308 = shalt.err (!%p305_p4)
}
  0x29   :  { %s309_s18 = scalar_lea.vmem %s37_s9, 2048  ;;  %p314_p6 = scmp.lt.s32.totalorder %s37_s9, %s37_s9 }
  0x2a   :  { %p310_p5 = scmp.ne.s32.totalorder %s37_s9, %s309_s18  ;;  %p315_p7 = scmp.lt.s32.totalorder %s309_s18, %s309_s18 }
  0x2c   :  { %p316_p8 = por %p315_p7, %p314_p6 }
  0x2e   :  { %p317_p9 = pnand %p316_p8, %p310_p5 }
  0x30   :  { %320 = shalt.err (!%p317_p9)
}
  0x31   :  { %s352_s0 = smov 128   ;;  %s353_s15 = smov 8  }
  0x32   :  { %42 = dma.hbm_to_vmem [thread:$0]  %s428_s2, 2048, %s37_s9, [#allocation7], %s352_s0, %s352_s0, %s353_s15  }
  0x33   :  { %343 = dma.done.wait [#allocation4], 128  }
  0x34   :  { %344 = vsyncadd [#allocation4], 4294967168 }
  0x35   :  { %345 = dma.done.wait [#allocation7], 2176  }
  0x36   :  { %346 = vsyncadd [#allocation7], 4294965120  ;;  %v354_v0 = vmov 0.0|0.0   ;;  %vm355_vm0 = vmmov 0   ;;  %v356_v1 = vmov 0.0   ;;  %v58_v2 = vld [vmem:[#allocation8] sm:$0xff] }
  0x37   :  { %220 = vmatprep.subr.bf16.mxu0 %v354_v0  ;;  %217 = vmatprep.mubr.msk.f32.mxu0 %vm355_vm0, %v356_v1  ;;  %v59_v3 = vld [vmem:[#allocation8 + $0x8] sm:$0xff]  ;;  %v60_v4 = vld [vmem:[#allocation8 + $0x10] sm:$0xff]  ;;  %v61_v6 = vld [vmem:[#allocation8 + $0x18] sm:$0xff]  ;;  %s357_s2 = smov [#allocation9]  }
  0x38   :  { %v221_v5 = vpack.c.bf16 %v59_v3, %v58_v2  ;;  %v224_v7 = vpack.c.bf16 %v61_v6, %v60_v4  ;;  %v62_v8 = vld [vmem:[#allocation8 + $0x20] sm:$0xff]  ;;  %v63_v9 = vld [vmem:[#allocation8 + $0x28] sm:$0xff]  ;;  %v64_v11 = vld [vmem:[#allocation8 + $0x30] sm:$0xff]  ;;  %s158_s21 = sshll.u32 %s357_s2, 4  ;;  %s159_s21 = int_to_ptr.vmem [resolvable:$true] %s158_s21 }
  0x39   :  { %v227_v10 = vpack.c.bf16 %v63_v9, %v62_v8  ;;  %v65_v12 = vld [vmem:[#allocation8 + $0x38] sm:$0xff]  ;;  %v66_v14 = vld [vmem:[#allocation8 + $0x40] sm:$0xff]  ;;  %v67_v15 = vld [vmem:[#allocation8 + $0x48] sm:$0xff]  ;;  %s321_s22 = scalar_lea.vmem %s159_s21, 128  ;;  %p326_p11 = scmp.lt.s32.totalorder %s159_s21, %s159_s21 }
  0x3a   :  { %222 = vmatpush3.bf16.msra.mxu0 %v221_v5  ;;  %v230_v13 = vpack.c.bf16 %v65_v12, %v64_v11  ;;  %v233_v16 = vpack.c.bf16 %v67_v15, %v66_v14  ;;  %v68_v17 = vld [vmem:[#allocation8 + $0x50] sm:$0xff]  ;;  %v69_v18 = vld [vmem:[#allocation8 + $0x58] sm:$0xff]  ;;  %v70_v20 = vld [vmem:[#allocation8 + $0x60] sm:$0xff]  ;;  %p322_p10 = scmp.ne.s32.totalorder %s159_s21, %s321_s22  ;;  %p327_p12 = scmp.lt.s32.totalorder %s321_s22, %s321_s22 }
  0x3b   :  { %223 = vmatprep.subr.bf16.mxu0 %v354_v0  ;;  %v236_v19 = vpack.c.bf16 %v69_v18, %v68_v17  ;;  %v71_v21 = vld [vmem:[#allocation8 + $0x68] sm:$0xff]  ;;  %v72_v23 = vld [vmem:[#allocation8 + $0x70] sm:$0xff]  ;;  %v73_v24 = vld [vmem:[#allocation8 + $0x78] sm:$0xff] }
  0x3c   :  { %v239_v22 = vpack.c.bf16 %v71_v21, %v70_v20  ;;  %v242_v25 = vpack.c.bf16 %v73_v24, %v72_v23  ;;  %v56_v26 = vld [vmem:[#allocation6] sm:$0xff]  ;;  %v75_v27 = vld [vmem:[#allocation3] sm:$0xff]  ;;  %p328_p13 = por %p327_p12, %p326_p11 }
  0x3e   :  { %225 = vmatpush3.bf16.msra.mxu0 %v224_v7  ;;  %p329_p0 = pnand %p328_p13, %p322_p10 }
  0x3f   :  { %226 = vmatprep.subr.bf16.mxu0 %v354_v0 }
  0x42   :  { %228 = vmatpush3.bf16.msra.mxu0 %v227_v10 }
  0x43   :  { %229 = vmatprep.subr.bf16.mxu0 %v354_v0 }
  0x46   :  { %231 = vmatpush3.bf16.msra.mxu0 %v230_v13 }
  0x47   :  { %232 = vmatprep.subr.bf16.mxu0 %v354_v0 }
  0x4a   :  { %234 = vmatpush3.bf16.msra.mxu0 %v233_v16 }
  0x4b   :  { %235 = vmatprep.subr.bf16.mxu0 %v354_v0 }
  0x4e   :  { %237 = vmatpush3.bf16.msra.mxu0 %v236_v19 }
  0x4f   :  { %238 = vmatprep.subr.bf16.mxu0 %v354_v0 }
  0x52   :  { %240 = vmatpush3.bf16.msra.mxu0 %v239_v22 }
  0x53   :  { %241 = vmatprep.subr.bf16.mxu0 %v354_v0 }
  0x56   :  { %243 = vmatpush3.bf16.msra.mxu0 %v242_v25 }
  0x59   :  { %218 = vmatmul.mubr.f32.vlgmr.msra.gmra.mrb[0].mxu0 %v56_v26 }
 0x12c   :  { %v142_v28 = vpop.f32.mrb[0].mxu0 }
 0x12d   :  { %v143_v29 = vadd.f32 %v142_v28, %v75_v27  ;;  %v219_v30 = vpop.f32.mrb[1].mxu0 }
 0x12f   :  { %253 = vtanh.f32 %v143_v29 }
 0x139   :  { %v254_v31 = vpop.eup %253 }
 0x13a   :  { %v147_v32 = vsub.f32 %v254_v31, %v56_v26 }
 0x13c   :  { %v148_v33 = vmul.f32 0.5, %v147_v32 }
 0x13e   :  { %v149_v34 = vadd.f32 %v148_v33, %v56_v26 }
 0x140   :  { %150 = vst [vmem:[#allocation9] sm:$0xff] %v149_v34 }
 0x141   :  { %332 = shalt.err (!%p329_p0)
}
 0x142   :  { %s333_s25 = scalar_lea.hbm %s429_s3, 128 }
 0x143   :  { %p334_p1 = scmp.ne.s32.totalorder %s429_s3, %s333_s25  ;;  %p337_p2 = scmp.lt.u32.totalorder %s333_s25, %s429_s3 }
 0x145   :  { %p339_p3 = pnand %p337_p2, %p334_p1 }
 0x147   :  { %342 = shalt.err (!%p339_p3)
}
 0x148   :  { %161 = dma.vmem_to_hbm [thread:$0]  %s159_s21, 128, %s429_s3, [#allocation5]  }
 0x149   :  { %347 = dma.done.wait [#allocation5], 128  }
 0x14a   :  { %348 = vsyncadd [#allocation5], 4294967168 }
 0x14b   :  { %165 = vsyncpa [#allocation4], 1 }
 0x14c   :  { %166 = vsyncpa [#allocation7], 1 }
 0x14d   :  { %167 = vsyncpa [#allocation5], 1 }

</bundles_post_ra>
